<compile_context>
chip_gen: v7x
topology: tpu7x:2x2x1
jax: 0.10.0
libtpu: 0.0.40
codegen_flags: <defaults>
</compile_context>

<pallas_src>
import functools

import jax
import jax.numpy as jnp
from jax import lax
from jax.experimental import pallas as pl
from jax.experimental.pallas import tpu as pltpu


def _mha_kernel(x_ref, wqkv_ref, wproj_ref, bproj_ref, o_ref, *,
                batch, seq, n_head, head_size, compute_dtype):
    """Fused multi-head causal self-attention, single grid step.

    x_ref    : (B*T, C)  compute_dtype   flattened tokens (batch-major)
    wqkv_ref : (C, 3*C)  compute_dtype   [Wq_h0..Wq_hN | Wk_h0..Wk_hN | Wv_h0..Wv_hN]
                                          (query block pre-scaled by C**-0.5)
    wproj_ref: (C, C)    compute_dtype   output projection (already transposed)
    bproj_ref: (1, C)    float32         output projection bias
    o_ref    : (B*T, C)  float32
    """
    B, T, H, NH = batch, seq, head_size, n_head
    C = NH * H

    x = x_ref[...]

    # Fused QKV projection for all heads: one MXU push, f32 accumulation.
    qkv = jnp.dot(x, wqkv_ref[...], preferred_element_type=jnp.float32)  # (BT, 3C)

    # Causal mask, built once and shared by every head / batch element.
    row = lax.broadcasted_iota(jnp.int32, (T, T), 0)
    col = lax.broadcasted_iota(jnp.int32, (T, T), 1)
    causal = (col <= row)[None, :, :]                                    # (1, T, T)

    head_outs = []
    for h in range(NH):
        # Static lane slices of the fused projection result (scale is already
        # folded into the query weights, so no in-kernel scaling).
        q = qkv[:, h * H:(h + 1) * H].reshape(B, T, H)
        k = qkv[:, C + h * H:C + (h + 1) * H].reshape(B, T, H)
        v = qkv[:, 2 * C + h * H:2 * C + (h + 1) * H].reshape(B, T, H)

        # Scores: contract last dims, batched over B — no transpose of k.
        s = lax.dot_general(
            q.astype(compute_dtype), k.astype(compute_dtype),
            dimension_numbers=(((2,), (2,)), ((0,), (0,))),
            preferred_element_type=jnp.float32)                          # (B, T, T)
        s = jnp.where(causal, s, -1e30)   # large finite, NaN-safe vs -inf

        # Numerically stable softmax in f32; reciprocal goes to the EUP slot.
        m = jnp.max(s, axis=-1, keepdims=True)
        e = jnp.exp(s - m)
        denom = jnp.sum(e, axis=-1, keepdims=True)
        p = e * pl.reciprocal(denom, approx=True)
        # attention-weight dropout == identity (eval mode)

        o_h = lax.dot_general(
            p.astype(compute_dtype), v.astype(compute_dtype),
            dimension_numbers=(((2,), (1,)), ((0,), (0,))),
            preferred_element_type=jnp.float32)                          # (B, T, H)
        head_outs.append(o_h.reshape(B * T, H))

    concat = jnp.concatenate(head_outs, axis=-1)                         # (BT, C)

    # Output projection + bias (post-proj dropout == identity in eval mode).
    out = jnp.dot(concat.astype(compute_dtype), wproj_ref[...],
                  preferred_element_type=jnp.float32) + bproj_ref[...]
    o_ref[...] = out


def mha_forward(x, w_keys, w_queries, w_values, w_proj, b_proj, *,
                compute_dtype=jnp.bfloat16):
    """MultiHeadAttention forward (eval mode), matching the PyTorch module.

    x        : (B, T, C)       float32
    w_keys   : (n_head, H, C)  per-head key   weights, PyTorch (out, in) layout
    w_queries: (n_head, H, C)  per-head query weights
    w_values : (n_head, H, C)  per-head value weights
    w_proj   : (C, C)          proj weight, PyTorch (out, in) layout
    b_proj   : (C,)            proj bias
    """
    B, T, C = x.shape
    NH, H, _ = w_keys.shape
    assert NH * H == C

    scale = C ** (-0.5)  # PyTorch source scales by C**-0.5 (not head_size**-0.5)

    # --- glue: fuse all per-head weights into one (C, 3C) matrix, transposed
    # so the kernel computes x @ W; fold the softmax scale into the Q columns.
    wq = jnp.concatenate([w_queries[h].T for h in range(NH)], axis=1) * scale
    wk = jnp.concatenate([w_keys[h].T for h in range(NH)], axis=1)
    wv = jnp.concatenate([w_values[h].T for h in range(NH)], axis=1)
    w_qkv = jnp.concatenate([wq, wk, wv], axis=1).astype(compute_dtype)  # (C, 3C)

    w_proj_t = jnp.asarray(w_proj.T, dtype=compute_dtype)                # (C, C)
    b_proj_2d = jnp.asarray(b_proj, dtype=jnp.float32).reshape(1, C)

    x_flat = x.reshape(B * T, C).astype(compute_dtype)                   # (BT, C)

    kernel = functools.partial(
        _mha_kernel, batch=B, seq=T, n_head=NH, head_size=H,
        compute_dtype=compute_dtype)

    flops = (2 * B * T * C * 3 * C                 # fused QKV projection
             + NH * 2 * (2 * B * T * T * H)        # scores + probs @ V
             + 2 * B * T * C * C)                  # output projection
    transcendentals = NH * B * T * T + NH * B * T  # exp + reciprocal
    bytes_accessed = (x_flat.size * x_flat.dtype.itemsize
                      + w_qkv.size * w_qkv.dtype.itemsize
                      + w_proj_t.size * w_proj_t.dtype.itemsize
                      + b_proj_2d.size * 4
                      + B * T * C * 4)

    out_flat = pl.pallas_call(
        kernel,
        out_shape=jax.ShapeDtypeStruct((B * T, C), jnp.float32),
        grid_spec=pltpu.PrefetchScalarGridSpec(
            num_scalar_prefetch=0,
            grid=(1,),  # single step — no per-step grid overhead
            in_specs=[
                pl.BlockSpec((B * T, C), lambda i: (0, 0)),   # x (flattened)
                pl.BlockSpec((C, 3 * C), lambda i: (0, 0)),   # fused W_qkv
                pl.BlockSpec((C, C), lambda i: (0, 0)),       # W_proj^T
                pl.BlockSpec((1, C), lambda i: (0, 0)),       # b_proj
            ],
            out_specs=pl.BlockSpec((B * T, C), lambda i: (0, 0)),
        ),
        compiler_params=pltpu.CompilerParams(
            dimension_semantics=("arbitrary",)),
        cost_estimate=pl.CostEstimate(
            flops=flops, transcendentals=transcendentals,
            bytes_accessed=bytes_accessed),
    )(x_flat, w_qkv, w_proj_t, b_proj_2d)

    return out_flat.reshape(B, T, C)


def _reference(x, w_keys, w_queries, w_values, w_proj, b_proj):
    """Pure-JAX f32 reference replicating PyTorch MultiHeadAttention (eval)."""
    B, T, C = x.shape
    NH = w_keys.shape[0]
    outs = []
    mask = jnp.tril(jnp.ones((T, T), dtype=bool))
    for h in range(NH):
        k = x @ w_keys[h].T
        q = x @ w_queries[h].T
        v = x @ w_values[h].T
        wei = (q @ jnp.swapaxes(k, -2, -1)) * (C ** -0.5)
        wei = jnp.where(mask, wei, -jnp.inf)
        wei = jax.nn.softmax(wei, axis=-1)
        outs.append(wei @ v)
    out = jnp.concatenate(outs, axis=-1)
    return out @ w_proj.T + b_proj


if __name__ == "__main__":
    # Small shapes consistent with the module: B=2, block_size=T=8,
    # n_embd=C=32, n_head=2 => head_size=16.
    B, T, C, NH = 2, 8, 32, 2
    H = C // NH

    key = jax.random.PRNGKey(0)
    kx, kk, kq, kv, kp, kb = jax.random.split(key, 6)

    x = jax.random.normal(kx, (B, T, C), dtype=jnp.float32)
    bound = 1.0 / (C ** 0.5)
    w_keys = jax.random.uniform(kk, (NH, H, C), minval=-bound, maxval=bound,
                                dtype=jnp.float32)
    w_queries = jax.random.uniform(kq, (NH, H, C), minval=-bound, maxval=bound,
                                   dtype=jnp.float32)
    w_values = jax.random.uniform(kv, (NH, H, C), minval=-bound, maxval=bound,
                                  dtype=jnp.float32)
    w_proj = jax.random.uniform(kp, (C, C), minval=-bound, maxval=bound,
                                dtype=jnp.float32)
    b_proj = jax.random.uniform(kb, (C,), minval=-bound, maxval=bound,
                                dtype=jnp.float32)

    ref = _reference(x, w_keys, w_queries, w_values, w_proj, b_proj)

    # bf16 MXU inputs + approx reciprocal -> relaxed tolerance vs f32 reference.
    out = mha_forward(x, w_keys, w_queries, w_values, w_proj, b_proj)
    out = jax.block_until_ready(out)
    assert out.shape == (B, T, C), out.shape
    assert jnp.allclose(out, ref, atol=3e-2, rtol=3e-2), (
        "bf16 mismatch, max abs err = %f" % float(jnp.max(jnp.abs(out - ref))))

    # f32 compute path: tight check that the kernel semantics match the module.
    out_f32 = mha_forward(x, w_keys, w_queries, w_values, w_proj, b_proj,
                          compute_dtype=jnp.float32)
    out_f32 = jax.block_until_ready(out_f32)
    assert jnp.allclose(out_f32, ref, atol=2e-3, rtol=2e-3), (
        "f32 mismatch, max abs err = %f" % float(jnp.max(jnp.abs(out_f32 - ref))))

    print("KERNEL_OK")
</pallas_src>

<mosaic_0001>
module attributes {stable_mosaic.version = 11 : i64} {
  func.func @_mha_kernel(%arg0: i32, %arg1: memref<16x32xbf16, #tpu.memory_space<vmem>>, %arg2: memref<32x96xbf16, #tpu.memory_space<vmem>>, %arg3: memref<32x32xbf16, #tpu.memory_space<vmem>>, %arg4: memref<1x32xf32, #tpu.memory_space<vmem>>, %arg5: memref<16x32xf32, #tpu.memory_space<vmem>>) attributes {dimension_semantics = [#tpu.dimension_semantics<arbitrary>], iteration_bounds = array<i64: 1>, scalar_prefetch = 0 : i64, scratch_operands = 0 : i64, tpu.core_type = #tpu.core_type<tc>, window_params = [{pipeline_mode = #tpu.pipeline_mode<synchronous>, transform_indices = @transform_0, window_bounds = array<i64: 16, 32>}, {pipeline_mode = #tpu.pipeline_mode<synchronous>, transform_indices = @transform_1, window_bounds = array<i64: 32, 96>}, {pipeline_mode = #tpu.pipeline_mode<synchronous>, transform_indices = @transform_2, window_bounds = array<i64: 32, 32>}, {pipeline_mode = #tpu.pipeline_mode<synchronous>, transform_indices = @transform_3, window_bounds = array<i64: 1, 32>}, {pipeline_mode = #tpu.pipeline_mode<synchronous>, transform_indices = @transform_4, window_bounds = array<i64: 16, 32>}]} {
    %c0 = arith.constant 0 : index
    %c0_0 = arith.constant 0 : index
    %0 = vector.load %arg1[%c0, %c0_0] : memref<16x32xbf16, #tpu.memory_space<vmem>>, vector<16x32xbf16>
    %c0_1 = arith.constant 0 : index
    %c0_2 = arith.constant 0 : index
    %1 = vector.load %arg2[%c0_1, %c0_2] : memref<32x96xbf16, #tpu.memory_space<vmem>>, vector<32x96xbf16>
    %cst = arith.constant dense<0.000000e+00> : vector<16x96xf32>
    %2 = tpu.matmul %0, %1, %cst {dimension_numbers = #tpu.dot_dimension_numbers<[1], [0], [0], [1], [0, 0, 1, 1], [], []>} : vector<16x32xbf16>, vector<32x96xbf16>, vector<16x96xf32> -> vector<16x96xf32>
    %3 = tpu.iota {dimensions = array<i32: 0>} : vector<8x8xi32>
    %4 = tpu.iota {dimensions = array<i32: 1>} : vector<8x8xi32>
    %5 = arith.cmpi sle, %4, %3 : vector<8x8xi32>
    %6 = vector.shape_cast %5 : vector<8x8xi1> to vector<1x8x8xi1>
    %7 = vector.extract_strided_slice %2 {offsets = [0, 0], sizes = [16, 16], strides = [1, 1]} : vector<16x96xf32> to vector<16x16xf32>
    %8 = vector.shape_cast %7 : vector<16x16xf32> to vector<2x8x16xf32>
    %9 = vector.extract_strided_slice %2 {offsets = [0, 32], sizes = [16, 16], strides = [1, 1]} : vector<16x96xf32> to vector<16x16xf32>
    %10 = vector.shape_cast %9 : vector<16x16xf32> to vector<2x8x16xf32>
    %11 = vector.extract_strided_slice %2 {offsets = [0, 64], sizes = [16, 16], strides = [1, 1]} : vector<16x96xf32> to vector<16x16xf32>
    %12 = vector.shape_cast %11 : vector<16x16xf32> to vector<2x8x16xf32>
    %13 = arith.truncf %8 : vector<2x8x16xf32> to vector<2x8x16xbf16>
    %14 = arith.truncf %10 : vector<2x8x16xf32> to vector<2x8x16xbf16>
    %cst_3 = arith.constant dense<0.000000e+00> : vector<2x8x8xf32>
    %15 = tpu.matmul %13, %14, %cst_3 {dimension_numbers = #tpu.dot_dimension_numbers<[2], [2], [1], [1], [0, 0, 0, 1, 1, 1], [0], [0]>} : vector<2x8x16xbf16>, vector<2x8x16xbf16>, vector<2x8x8xf32> -> vector<2x8x8xf32>
    %cst_4 = arith.constant -1.000000e+30 : f32
    %16 = vector.shape_cast %6 : vector<1x8x8xi1> to vector<1x8x8xi1>
    %17 = vector.broadcast %16 : vector<1x8x8xi1> to vector<2x8x8xi1>
    %18 = vector.broadcast %cst_4 : f32 to vector<2x8x8xf32>
    %19 = arith.select %17, %15, %18 : vector<2x8x8xi1>, vector<2x8x8xf32>
    %cst_5 = arith.constant dense<0xFF800000> : vector<2x8xf32>
    %20 = vector.multi_reduction <maximumf>, %19, %cst_5 [2] : vector<2x8x8xf32> to vector<2x8xf32>
    %21 = vector.shape_cast %20 : vector<2x8xf32> to vector<2x8x1xf32>
    %22 = vector.broadcast %21 : vector<2x8x1xf32> to vector<2x8x8xf32>
    %23 = arith.subf %19, %22 : vector<2x8x8xf32>
    %24 = math.exp %23 : vector<2x8x8xf32>
    %cst_6 = arith.constant dense<0.000000e+00> : vector<2x8xf32>
    %25 = vector.multi_reduction <add>, %24, %cst_6 [2] : vector<2x8x8xf32> to vector<2x8xf32>
    %26 = vector.shape_cast %25 : vector<2x8xf32> to vector<2x8x1xf32>
    %27 = tpu.reciprocal %26 {approx = true} : vector<2x8x1xf32> -> vector<2x8x1xf32>
    %28 = vector.broadcast %27 : vector<2x8x1xf32> to vector<2x8x8xf32>
    %29 = arith.mulf %24, %28 : vector<2x8x8xf32>
    %30 = arith.truncf %29 : vector<2x8x8xf32> to vector<2x8x8xbf16>
    %31 = arith.truncf %12 : vector<2x8x16xf32> to vector<2x8x16xbf16>
    %cst_7 = arith.constant dense<0.000000e+00> : vector<2x8x16xf32>
    %32 = tpu.matmul %30, %31, %cst_7 {dimension_numbers = #tpu.dot_dimension_numbers<[2], [1], [1], [2], [0, 0, 0, 1, 1, 2], [0], [0]>} : vector<2x8x8xbf16>, vector<2x8x16xbf16>, vector<2x8x16xf32> -> vector<2x8x16xf32>
    %33 = vector.shape_cast %32 : vector<2x8x16xf32> to vector<16x16xf32>
    %34 = vector.extract_strided_slice %2 {offsets = [0, 16], sizes = [16, 16], strides = [1, 1]} : vector<16x96xf32> to vector<16x16xf32>
    %35 = vector.shape_cast %34 : vector<16x16xf32> to vector<2x8x16xf32>
    %36 = vector.extract_strided_slice %2 {offsets = [0, 48], sizes = [16, 16], strides = [1, 1]} : vector<16x96xf32> to vector<16x16xf32>
    %37 = vector.shape_cast %36 : vector<16x16xf32> to vector<2x8x16xf32>
    %38 = vector.extract_strided_slice %2 {offsets = [0, 80], sizes = [16, 16], strides = [1, 1]} : vector<16x96xf32> to vector<16x16xf32>
    %39 = vector.shape_cast %38 : vector<16x16xf32> to vector<2x8x16xf32>
    %40 = arith.truncf %35 : vector<2x8x16xf32> to vector<2x8x16xbf16>
    %41 = arith.truncf %37 : vector<2x8x16xf32> to vector<2x8x16xbf16>
    %cst_8 = arith.constant dense<0.000000e+00> : vector<2x8x8xf32>
    %42 = tpu.matmul %40, %41, %cst_8 {dimension_numbers = #tpu.dot_dimension_numbers<[2], [2], [1], [1], [0, 0, 0, 1, 1, 1], [0], [0]>} : vector<2x8x16xbf16>, vector<2x8x16xbf16>, vector<2x8x8xf32> -> vector<2x8x8xf32>
    %cst_9 = arith.constant -1.000000e+30 : f32
    %43 = vector.shape_cast %6 : vector<1x8x8xi1> to vector<1x8x8xi1>
    %44 = vector.broadcast %43 : vector<1x8x8xi1> to vector<2x8x8xi1>
    %45 = vector.broadcast %cst_9 : f32 to vector<2x8x8xf32>
    %46 = arith.select %44, %42, %45 : vector<2x8x8xi1>, vector<2x8x8xf32>
    %cst_10 = arith.constant dense<0xFF800000> : vector<2x8xf32>
    %47 = vector.multi_reduction <maximumf>, %46, %cst_10 [2] : vector<2x8x8xf32> to vector<2x8xf32>
    %48 = vector.shape_cast %47 : vector<2x8xf32> to vector<2x8x1xf32>
    %49 = vector.broadcast %48 : vector<2x8x1xf32> to vector<2x8x8xf32>
    %50 = arith.subf %46, %49 : vector<2x8x8xf32>
    %51 = math.exp %50 : vector<2x8x8xf32>
    %cst_11 = arith.constant dense<0.000000e+00> : vector<2x8xf32>
    %52 = vector.multi_reduction <add>, %51, %cst_11 [2] : vector<2x8x8xf32> to vector<2x8xf32>
    %53 = vector.shape_cast %52 : vector<2x8xf32> to vector<2x8x1xf32>
    %54 = tpu.reciprocal %53 {approx = true} : vector<2x8x1xf32> -> vector<2x8x1xf32>
    %55 = vector.broadcast %54 : vector<2x8x1xf32> to vector<2x8x8xf32>
    %56 = arith.mulf %51, %55 : vector<2x8x8xf32>
    %57 = arith.truncf %56 : vector<2x8x8xf32> to vector<2x8x8xbf16>
    %58 = arith.truncf %39 : vector<2x8x16xf32> to vector<2x8x16xbf16>
    %cst_12 = arith.constant dense<0.000000e+00> : vector<2x8x16xf32>
    %59 = tpu.matmul %57, %58, %cst_12 {dimension_numbers = #tpu.dot_dimension_numbers<[2], [1], [1], [2], [0, 0, 0, 1, 1, 2], [0], [0]>} : vector<2x8x8xbf16>, vector<2x8x16xbf16>, vector<2x8x16xf32> -> vector<2x8x16xf32>
    %60 = vector.shape_cast %59 : vector<2x8x16xf32> to vector<16x16xf32>
    %61 = tpu.concatenate %33, %60 in 1 : vector<16x16xf32>, vector<16x16xf32> -> vector<16x32xf32>
    %62 = arith.truncf %61 : vector<16x32xf32> to vector<16x32xbf16>
    %c0_13 = arith.constant 0 : index
    %c0_14 = arith.constant 0 : index
    %63 = vector.load %arg3[%c0_13, %c0_14] : memref<32x32xbf16, #tpu.memory_space<vmem>>, vector<32x32xbf16>
    %cst_15 = arith.constant dense<0.000000e+00> : vector<16x32xf32>
    %64 = tpu.matmul %62, %63, %cst_15 {dimension_numbers = #tpu.dot_dimension_numbers<[1], [0], [0], [1], [0, 0, 1, 1], [], []>} : vector<16x32xbf16>, vector<32x32xbf16>, vector<16x32xf32> -> vector<16x32xf32>
    %c0_16 = arith.constant 0 : index
    %c0_17 = arith.constant 0 : index
    %65 = vector.load %arg4[%c0_16, %c0_17] : memref<1x32xf32, #tpu.memory_space<vmem>>, vector<1x32xf32>
    %66 = vector.broadcast %65 : vector<1x32xf32> to vector<16x32xf32>
    %67 = arith.addf %64, %66 : vector<16x32xf32>
    %c0_18 = arith.constant 0 : index
    %c0_19 = arith.constant 0 : index
    %68 = vector.load %arg5[%c0_18, %c0_19] : memref<16x32xf32, #tpu.memory_space<vmem>>, vector<16x32xf32>
    tpu.vector_store %arg5[%c0_18, %c0_19], %67 {strides = array<i32>} : memref<16x32xf32, #tpu.memory_space<vmem>>, vector<16x32xf32>,
    return
  }
  func.func @transform_0(%arg0: i32) -> (i32, i32) {
    %c0_i32 = arith.constant 0 : i32
    %c0_i32_0 = arith.constant 0 : i32
    %c0_i32_1 = arith.constant 0 : i32
    return %c0_i32, %c0_i32_0 : i32, i32
  }
  func.func @transform_1(%arg0: i32) -> (i32, i32) {
    %c0_i32 = arith.constant 0 : i32
    %c0_i32_0 = arith.constant 0 : i32
    %c0_i32_1 = arith.constant 0 : i32
    return %c0_i32, %c0_i32_0 : i32, i32
  }
  func.func @transform_2(%arg0: i32) -> (i32, i32) {
    %c0_i32 = arith.constant 0 : i32
    %c0_i32_0 = arith.constant 0 : i32
    %c0_i32_1 = arith.constant 0 : i32
    return %c0_i32, %c0_i32_0 : i32, i32
  }
  func.func @transform_3(%arg0: i32) -> (i32, i32) {
    %c0_i32 = arith.constant 0 : i32
    %c0_i32_0 = arith.constant 0 : i32
    %c0_i32_1 = arith.constant 0 : i32
    return %c0_i32, %c0_i32_0 : i32, i32
  }
  func.func @transform_4(%arg0: i32) -> (i32, i32) {
    %c0_i32 = arith.constant 0 : i32
    %c0_i32_0 = arith.constant 0 : i32
    %c0_i32_1 = arith.constant 0 : i32
    return %c0_i32, %c0_i32_0 : i32, i32
  }
}

</mosaic_0001>

<bundles_post_ra>
// kernel: tpu_custom_call.1
= control target key start
LH: loop header
LB: loop body
LE: loop exit
PB: predicated region body
PF: predicated region fallthrough
CT: control target
= control target key end

     0   :  { %9 = vsyncpa [#allocation3], 0  ;;  %s1128_s0 = inlined_call_operand.hbm [shape: bf16[16,32], index: 0, kind: input, shape index: {}]   ;;  %s1129_s1 = inlined_call_operand.hbm [shape: bf16[32,96], index: 1, kind: input, shape index: {}]   ;;  %s1130_s2 = inlined_call_operand.hbm [shape: bf16[32,32], index: 2, kind: input, shape index: {}]   ;;  %s1131_s3 = inlined_call_operand.vmem [shape: f32[1,32], index: 3, kind: input, shape index: {}]   ;;  %s1132_s4 = inlined_call_operand.hbm [shape: f32[16,32], index: 4, kind: output, shape index: {}]  }
   0x1   :  { %10 = vsyncpa [#allocation6], 0 }
   0x2   :  { %11 = vsyncpa [#allocation4], 0  ;;  %s917_s15 = smov [#allocation5]   ;;  %s918_s17 = smov [#allocation2]  }
   0x3   :  { %s29_s16 = sshll.u32 %s917_s15, 4  ;;  %s17_s18 = sshll.u32 %s918_s17, 4  ;;  %s30_s16 = int_to_ptr.vmem [resolvable:$true] %s29_s16  ;;  %s957_s18 = int_to_ptr.vmem [resolvable:$true] %s17_s18 }
   0x4   :  { %s823_s21 = scalar_lea.hbm %s1129_s1, 256 }
   0x5   :  { %p824_p0 = scmp.ne.s32.totalorder %s1129_s1, %s823_s21  ;;  %p827_p1 = scmp.lt.u32.totalorder %s823_s21, %s1129_s1 }
   0x7   :  { %p829_p2 = pnand %p827_p1, %p824_p0 }
   0x9   :  { %832 = shalt.err (!%p829_p2)
}
   0xa   :  { %s833_s26 = scalar_lea.vmem %s30_s16, 256  ;;  %p838_p4 = scmp.lt.s32.totalorder %s30_s16, %s30_s16 }
   0xb   :  { %p834_p3 = scmp.ne.s32.totalorder %s30_s16, %s833_s26  ;;  %p839_p5 = scmp.lt.s32.totalorder %s833_s26, %s833_s26 }
   0xd   :  { %p840_p6 = por %p839_p5, %p838_p4 }
   0xf   :  { %p841_p7 = pnand %p840_p6, %p834_p3 }
  0x11   :  { %844 = shalt.err (!%p841_p7)
}
  0x12   :  { %s919_s27 = smov 64   ;;  %s920_s28 = smov 4  }
  0x13   :  { %35 = dma.hbm_to_vmem [thread:$0]  %s1129_s1, 256, %s30_s16, [#allocation6], %s919_s27, %s919_s27, %s920_s28  }
  0x14   :  { %s845_s7 = scalar_lea.hbm %s1128_s0, 128 }
  0x15   :  { %p846_p8 = scmp.ne.s32.totalorder %s1128_s0, %s845_s7  ;;  %p849_p9 = scmp.lt.u32.totalorder %s845_s7, %s1128_s0 }
  0x17   :  { %p851_p10 = pnand %p849_p9, %p846_p8 }
  0x19   :  { %854 = shalt.err (!%p851_p10)
}
  0x1a   :  { %s855_s12 = scalar_lea.vmem %s957_s18, 128  ;;  %p860_p12 = scmp.lt.s32.totalorder %s957_s18, %s957_s18 }
  0x1b   :  { %p856_p11 = scmp.ne.s32.totalorder %s957_s18, %s855_s12  ;;  %p861_p13 = scmp.lt.s32.totalorder %s855_s12, %s855_s12 }
  0x1d   :  { %p862_p0 = por %p861_p13, %p860_p12 }
  0x1f   :  { %p863_p1 = pnand %p862_p0, %p856_p11 }
  0x21   :  { %866 = shalt.err (!%p863_p1)
}
  0x22   :  { %23 = dma.hbm_to_vmem [thread:$0]  %s1128_s0, 128, %s957_s18, [#allocation3], %s919_s27, %s919_s27, %s920_s28  }
  0x23   :  { %s921_s14 = smov [#allocation7]   ;;  %s867_s19 = scalar_lea.hbm %s1130_s2, 256 }
  0x24   :  { %s41_s15 = sshll.u32 %s921_s14, 4  ;;  %p868_p2 = scmp.ne.s32.totalorder %s1130_s2, %s867_s19  ;;  %s42_s15 = int_to_ptr.vmem [resolvable:$true] %s41_s15 }
  0x25   :  { %p871_p3 = scmp.lt.u32.totalorder %s867_s19, %s1130_s2 }
  0x27   :  { %p873_p4 = pnand %p871_p3, %p868_p2 }
  0x29   :  { %876 = shalt.err (!%p873_p4)
}
  0x2a   :  { %s877_s24 = scalar_lea.vmem %s42_s15, 256  ;;  %p882_p6 = scmp.lt.s32.totalorder %s42_s15, %s42_s15 }
  0x2b   :  { %p878_p5 = scmp.ne.s32.totalorder %s42_s15, %s877_s24  ;;  %p883_p7 = scmp.lt.s32.totalorder %s877_s24, %s877_s24 }
  0x2d   :  { %p884_p8 = por %p883_p7, %p882_p6 }
  0x2f   :  { %p885_p9 = pnand %p884_p8, %p878_p5 }
  0x31   :  { %888 = shalt.err (!%p885_p9)
}
  0x32   :  { %47 = dma.hbm_to_vmem [thread:$0]  %s1130_s2, 256, %s42_s15, [#allocation6], %s919_s27, %s919_s27, %s920_s28  }
  0x33   :  { %911 = dma.done.wait [#allocation3], 128  }
  0x34   :  { %912 = vsyncadd [#allocation3], 4294967168 }
  0x35   :  { %913 = dma.done.wait [#allocation6], 512  }
  0x36   :  { %914 = vsyncadd [#allocation6], 4294966784  ;;  %v922_v0 = vmov 0.0   ;;  %vm923_vm0 = vmmov 0   ;;  %v802_v1 = vld [vmem:[#allocation5] sm:$0xff]   ;;  %v803_v2 = vld [vmem:[#allocation5 + $0x8] sm:$0xff]   ;;  %v128_v14 = vlaneseq }
  0x37   :  { %718 = vmatprep.subr.bf16.mxu0 %v922_v0  ;;  %722 = vmatprep.mubr.msk.bf16.mxu0 %vm923_vm0, %v922_v0  ;;  %v804_v3 = vld [vmem:[#allocation2] sm:$0xff]   ;;  %vm83_vm1 = vcmask 261120   ;;  %s924_s2 = smov 96   ;;  %vm138_vm2 = vcmask 130048   ;;  %vm238_vm4 = vcmask 64512   ;;  %s925_s25 = smov 80  }
  0x38   :  { %726 = vmatprep.subr.bf16.mxu1 %v922_v0  ;;  %728 = vmatprep.mubr.msk.bf16.mxu1 %vm923_vm0, %v922_v0  ;;  %v1038_v15 = vshrl.u32 %v128_v14, 7  ;;  %v1040_v16 = vand.u32 127, %v128_v14  ;;  %vm268_vm5 = vcmask 1043456   ;;  %s926_s26 = smov 112   ;;  %s928_s28 = smov 16  }
  0x39   :  { %719 = vmatpush3.bf16.msra.mxu0 %v802_v1  ;;  %s929_s5 = smov [#allocation8]  }
  0x3a   :  { %720 = vmatprep.subr.bf16.mxu0 %v922_v0  ;;  %vm132_vm3 = vcmp.le.s32.totalorder %v1040_v16, %v1038_v15  ;;  %s667_s6 = sshll.u32 %s929_s5, 4  ;;  %s668_s6 = int_to_ptr.vmem [resolvable:$true] %s667_s6 }
  0x3b   :  { %s889_s7 = scalar_lea.vmem %s668_s6, 256  ;;  %p894_p11 = scmp.lt.s32.totalorder %s668_s6, %s668_s6 }
  0x3c   :  { %p890_p10 = scmp.ne.s32.totalorder %s668_s6, %s889_s7  ;;  %p895_p12 = scmp.lt.s32.totalorder %s889_s7, %s889_s7 }
  0x3d   :  { %721 = vmatpush3.bf16.msra.mxu0 %v803_v2 }
  0x3e   :  { %732 = vmatprep.subr.bf16.mxu0 %v922_v0  ;;  %p896_p13 = por %p895_p12, %p894_p11 }
  0x40   :  { %723 = vmatmul.mubr.msk.bf16.vlgmr.msra.gmra.mrb[0].mxu0 %vm83_vm1, %v804_v3  ;;  %p897_p0 = pnand %p896_p13, %p890_p10 }
  0x41   :  { %734 = vmatprep.mubr.msk.bf16.mxu0 %vm923_vm0, %v922_v0 }
 0x113   :  { %v121_v4 = vpop.f32.mrb[0].mxu0 }
 0x114   :  { %v1020_v5 = vpack.c.bf16 %v121_v4, %v121_v4  ;;  %v724_v6 = vpop.f32.mrb[1].mxu0 }
 0x115   :  { %v124_v7 = vpop.f32.mrb[2].mxu0 }
 0x116   :  { %136 = vrot.lane.b32.xlu0 %v1020_v5, %s924_s2  ;;  %v725_v8 = vpop.f32.mrb[3].mxu0  ;;  %v1023_v9 = vpack.c.bf16 %v124_v7, %v124_v7 }
 0x11a   :  { %186 = vrot.lane.b32.xlu0 %v1023_v9, %s924_s2 }
 0x188   :  { %v137_v10 = vpop.permute.xlu0 %136 }
 0x189   :  { %v143_v11 = vsel %vm138_vm2, %v137_v10, 0 }
 0x18a   :  { %727 = vmatpush3.bf16.xpose.msra.mxu1 %v143_v11 }
 0x18b   :  { %738 = vmatprep.subr.bf16.mxu1 %v922_v0 }
 0x18c   :  { %v187_v12 = vpop.permute.xlu0 %186 }
 0x18d   :  { %v192_v13 = vsel %vm138_vm2, %v187_v12, 0 }
 0x18e   :  { %733 = vmatpush3.bf16.xpose.msra.mxu0 %v192_v13 }
 0x18f   :  { %744 = vmatprep.subr.bf16.mxu0 %v922_v0 }
 0x191   :  { %729 = vmatmul.mubr.msk.bf16.vlgmr.msra.gmra.mrb[0].mxu1 %vm138_vm2, %v1020_v5 }
 0x192   :  { %740 = vmatprep.mubr.msk.bf16.mxu1 %vm923_vm0, %v922_v0 }
 0x195   :  { %735 = vmatmul.mubr.msk.bf16.vlgmr.msra.gmra.mrb[4].mxu0 %vm138_vm2, %v1023_v9 }
 0x196   :  { %746 = vmatprep.mubr.msk.bf16.mxu0 %vm923_vm0, %v922_v0 }
 0x264   :  { %v179_v17 = vpop.f32.mrb[0].mxu1 }
 0x265   :  { %v236_v18 = vsel %vm132_vm3, %v179_v17, -1e+30  ;;  %v730_v19 = vpop.f32.mrb[1].mxu1 }
 0x266   :  { %v182_v20 = vpop.f32.mrb[2].mxu1  ;;  %v239_v21 = vsel %vm238_vm4, %v236_v18, -inf }
 0x267   :  { %240 = vmax.xlane.f32.xlu1 %v239_v21  ;;  %v731_v22 = vpop.f32.mrb[3].mxu1 }
 0x268   :  { %v228_v23 = vpop.f32.mrb[4].mxu0 }
 0x269   :  { %v237_v24 = vsel %vm132_vm3, %v228_v23, -1e+30  ;;  %v736_v25 = vpop.f32.mrb[5].mxu0 }
 0x26a   :  { %v231_v26 = vpop.f32.mrb[6].mxu0  ;;  %v242_v27 = vsel %vm238_vm4, %v237_v24, -inf }
 0x26b   :  { %243 = vmax.xlane.f32.xlu1 %v242_v27  ;;  %v737_v28 = vpop.f32.mrb[7].mxu0 }
 0x27c   :  { %263 = vrot.lane.b32.xlu1 %v1020_v5, %s919_s27 }
 0x280   :  { %312 = vrot.lane.b32.xlu1 %v1023_v9, %s919_s27  ;;  %s927_s27 = smov 48  }
 0x284   :  { %362 = vrot.lane.b32.xlu1 %v1020_v5, %s925_s25 }
 0x2f4   :  { %v241_v29 = vpop.xlane.xlu1 %240 }
 0x2f5   :  { %v245_v30 = vsub.f32 %v236_v18, %v241_v29 }
 0x2f7   :  { %v247_v31 = vmul.f32 1.442695, %v245_v30 }
 0x2f8   :  { %v244_v32 = vpop.xlane.xlu1 %243 }
 0x2f9   :  { %807 = vpow2.f32 %v247_v31  ;;  %v246_v33 = vsub.f32 %v237_v24, %v244_v32 }
 0x2fb   :  { %v249_v34 = vmul.f32 1.442695, %v246_v33 }
 0x2fc   :  { %v264_v35 = vpop.permute.xlu1 %263 }
 0x2fd   :  { %809 = vpow2.f32 %v249_v34  ;;  %v270_v36 = vsel %vm268_vm5, %v264_v35, 0 }
 0x2fe   :  { %739 = vmatpush3.bf16.msra.mxu1 %v270_v36  ;;  %v805_v36 = vld [vmem:[#allocation7] sm:$0xff]  }
 0x2ff   :  { %750 = vmatprep.subr.bf16.mxu1 %v922_v0 }
 0x300   :  { %v313_v37 = vpop.permute.xlu1 %312 }
 0x301   :  { %v318_v38 = vsel %vm268_vm5, %v313_v37, 0  ;;  %v806_v37 = vld [vmem:[#allocation7 + $0x8] sm:$0xff]  }
 0x302   :  { %745 = vmatpush3.bf16.msra.mxu0 %v318_v38 }
 0x303   :  { %v808_v39 = vpop.eup %807  ;;  %756 = vmatprep.subr.bf16.mxu0 %v922_v0 }
 0x304   :  { %v251_v40 = vsel %vm238_vm4, %v808_v39, 0.0  ;;  %v363_v43 = vpop.permute.xlu1 %362 }
 0x305   :  { %252 = vadd.xlane.f32.xlu0 %v251_v40  ;;  %v368_v50 = vsel %vm138_vm2, %v363_v43, 0 }
 0x307   :  { %v810_v41 = vpop.eup %809 }
 0x308   :  { %v254_v42 = vsel %vm238_vm4, %v810_v41, 0.0 }
 0x309   :  { %255 = vadd.xlane.f32.xlu1 %v254_v42 }
 0x31a   :  { %412 = vrot.lane.b32.xlu1 %v1023_v9, %s925_s25 }
 0x31b   :  { %360 = vrot.lane.b32.xlu0 %v1020_v5, %s926_s26 }
 0x31e   :  { %410 = vrot.lane.b32.xlu1 %v1023_v9, %s926_s26 }
 0x392   :  { %v253_v44 = vpop.xlane.xlu0 %252 }
 0x393   :  { %811 = vrcp.f32 %v253_v44 }
 0x396   :  { %v256_v45 = vpop.xlane.xlu1 %255  ;;  %v361_v55 = vpop.permute.xlu0 %360 }
 0x397   :  { %813 = vrcp.f32 %v256_v45 }
 0x39a   :  { %v413_v52 = vpop.permute.xlu1 %412 }
 0x39b   :  { %v418_v54 = vsel %vm138_vm2, %v413_v52, 0  ;;  %v692_v52 = vld [vmem:[%s1131_s3] ss:$0 sm:$0xff] }
 0x39d   :  { %v812_v46 = vpop.eup %811 }
 0x39e   :  { %v259_v47 = vmul.f32 %v812_v46, %v808_v39  ;;  %v411_v56 = vpop.permute.xlu1 %410 }
 0x3a0   :  { %v261_v48 = vpack.c.bf16 %v259_v47, %v259_v47 }
 0x3a1   :  { %v814_v49 = vpop.eup %813 }
 0x3a2   :  { %v260_v51 = vmul.f32 %v814_v49, %v810_v41  ;;  %741 = vmatmul.mubr.msk.bf16.vlgmr.msra.gmra.mrb[4].mxu1 %vm238_vm4, %v261_v48 }
 0x3a3   :  { %751 = vmatpush3.bf16.xpose.msra.mxu1 %v368_v50  ;;  %752 = vmatprep.mubr.msk.bf16.mxu1 %vm923_vm0, %v922_v0 }
 0x3a4   :  { %v262_v53 = vpack.c.bf16 %v260_v51, %v260_v51  ;;  %762 = vmatprep.subr.bf16.mxu1 %v922_v0 }
 0x3a6   :  { %747 = vmatmul.mubr.msk.bf16.vlgmr.msra.gmra.mrb[8].mxu0 %vm238_vm4, %v262_v53 }
 0x3a7   :  { %757 = vmatpush3.bf16.xpose.msra.mxu0 %v418_v54  ;;  %758 = vmatprep.mubr.msk.bf16.mxu0 %vm923_vm0, %v922_v0 }
 0x3a8   :  { %768 = vmatprep.subr.bf16.mxu0 %v922_v0 }
 0x3aa   :  { %753 = vmatmul.mubr.msk.bf16.vlgmr.msra.gmra.mrb[8].mxu1 %vm138_vm2, %v361_v55 }
 0x3ab   :  { %764 = vmatprep.mubr.msk.bf16.mxu1 %vm923_vm0, %v922_v0 }
 0x3ae   :  { %759 = vmatmul.mubr.msk.bf16.vlgmr.msra.gmra.mrb[12].mxu0 %vm138_vm2, %v411_v56 }
 0x3af   :  { %770 = vmatprep.mubr.msk.bf16.mxu0 %vm923_vm0, %v922_v0 }
 0x475   :  { %v1082_v57 = vpop.f32.mrb[4].mxu1 }
 0x476   :  { %v742_v58 = vpop.f32.mrb[5].mxu1 }
 0x477   :  { %v309_v59 = vpop.f32.mrb[6].mxu1 }
 0x478   :  { %v743_v60 = vpop.f32.mrb[7].mxu1 }
 0x479   :  { %v1084_v61 = vpop.f32.mrb[8].mxu0 }
 0x47a   :  { %v748_v62 = vpop.f32.mrb[9].mxu0 }
 0x47b   :  { %v357_v63 = vpop.f32.mrb[10].mxu0 }
 0x47c   :  { %v749_v1 = vpop.f32.mrb[11].mxu0 }
 0x47d   :  { %v404_v2 = vpop.f32.mrb[8].mxu1 }
 0x47e   :  { %v460_v3 = vsel %vm132_vm3, %v404_v2, -1e+30  ;;  %v754_v4 = vpop.f32.mrb[9].mxu1 }
 0x47f   :  { %v407_v6 = vpop.f32.mrb[10].mxu1  ;;  %v462_v7 = vsel %vm238_vm4, %v460_v3, -inf }
 0x480   :  { %463 = vmax.xlane.f32.xlu1 %v462_v7  ;;  %v755_v8 = vpop.f32.mrb[11].mxu1 }
 0x481   :  { %v454_v10 = vpop.f32.mrb[12].mxu0 }
 0x482   :  { %v461_v11 = vsel %vm132_vm3, %v454_v10, -1e+30  ;;  %v760_v12 = vpop.f32.mrb[13].mxu0 }
 0x483   :  { %v457_v13 = vpop.f32.mrb[14].mxu0  ;;  %v465_v14 = vsel %vm238_vm4, %v461_v11, -inf }
 0x484   :  { %466 = vmax.xlane.f32.xlu0 %v465_v14  ;;  %v761_v17 = vpop.f32.mrb[15].mxu0 }
 0x49a   :  { %534 = vrot.lane.b32.xlu0 %v1023_v9, %s927_s27 }
 0x50d   :  { %v464_v18 = vpop.xlane.xlu1 %463 }
 0x50e   :  { %v468_v19 = vsub.f32 %v460_v3, %v464_v18 }
 0x510   :  { %v470_v20 = vmul.f32 1.442695, %v468_v19 }
 0x511   :  { %v467_v21 = vpop.xlane.xlu0 %466 }
 0x512   :  { %815 = vpow2.f32 %v470_v20  ;;  %v469_v22 = vsub.f32 %v461_v11, %v467_v21 }
 0x514   :  { %v472_v23 = vmul.f32 1.442695, %v469_v22 }
 0x515   :  { %v535_v24 = vpop.permute.xlu0 %534 }
 0x516   :  { %817 = vpow2.f32 %v472_v23  ;;  %v540_v15 = vsel %vm268_vm5, %v535_v24, 0 }
 0x517   :  { %769 = vmatpush3.bf16.msra.mxu0 %v540_v15 }
 0x51c   :  { %v816_v16 = vpop.eup %815 }
 0x51d   :  { %v474_v25 = vsel %vm238_vm4, %v816_v16, 0.0 }
 0x51e   :  { %475 = vadd.xlane.f32.xlu1 %v474_v25 }
 0x520   :  { %v818_v26 = vpop.eup %817 }
 0x521   :  { %v477_v27 = vsel %vm238_vm4, %v818_v26, 0.0 }
 0x522   :  { %478 = vadd.xlane.f32.xlu1 %v477_v27 }
 0x533   :  { %486 = vrot.lane.b32.xlu1 %v1020_v5, %s927_s27 }
 0x5ab   :  { %v476_v9 = vpop.xlane.xlu1 %475 }
 0x5ac   :  { %819 = vrcp.f32 %v476_v9 }
 0x5af   :  { %v479_v28 = vpop.xlane.xlu1 %478 }
 0x5b0   :  { %821 = vrcp.f32 %v479_v28 }
 0x5b3   :  { %v487_v29 = vpop.permute.xlu1 %486 }
 0x5b4   :  { %v492_v30 = vsel %vm268_vm5, %v487_v29, 0 }
 0x5b5   :  { %763 = vmatpush3.bf16.msra.mxu1 %v492_v30 }
 0x5b6   :  { %v820_v31 = vpop.eup %819  ;;  %774 = vmatprep.subr.bf16.mxu1 %v922_v0 }
 0x5b7   :  { %v482_v32 = vmul.f32 %v820_v31, %v816_v16 }
 0x5b9   :  { %v484_v33 = vpack.c.bf16 %v482_v32, %v482_v32 }
 0x5ba   :  { %v822_v34 = vpop.eup %821 }
 0x5bb   :  { %v483_v35 = vmul.f32 %v822_v34, %v818_v26  ;;  %765 = vmatmul.mubr.msk.bf16.vlgmr.msra.gmra.mrb[12].mxu1 %vm238_vm4, %v484_v33 }
 0x5bc   :  { %778 = vmatprep.mubr.msk.bf16.mxu1 %vm923_vm0, %v922_v0  ;;  %775 = vmatpush3.bf16.msra.mxu1 %v805_v36 }
 0x5bd   :  { %v485_v5 = vpack.c.bf16 %v483_v35, %v483_v35  ;;  %776 = vmatprep.subr.bf16.mxu1 %v922_v0 }
 0x5bf   :  { %771 = vmatmul.mubr.msk.bf16.vlgmr.msra.gmra.mrb[16].mxu0 %vm238_vm4, %v485_v5 }
 0x5c0   :  { %777 = vmatpush3.bf16.msra.mxu1 %v806_v37 }
 0x68e   :  { %v528_v38 = vpop.f32.mrb[12].mxu1 }
 0x68f   :  { %v766_v39 = vpop.f32.mrb[13].mxu1 }
 0x690   :  { %v531_v40 = vpop.f32.mrb[14].mxu1 }
 0x691   :  { %v767_v41 = vpop.f32.mrb[15].mxu1 }
 0x692   :  { %v576_v42 = vpop.f32.mrb[16].mxu0 }
 0x693   :  { %v797_v43 = vpack.i.bf16 %v576_v42, %v528_v38  ;;  %v772_v44 = vpop.f32.mrb[17].mxu0 }
 0x694   :  { %v579_v45 = vpop.f32.mrb[18].mxu0 }
 0x695   :  { %798 = vrot.lane.b32.xlu1 %v797_v43, %s928_s28  ;;  %v773_v46 = vpop.f32.mrb[19].mxu0 }
 0x707   :  { %v799_v47 = vpop.permute.xlu1 %798 }
 0x708   :  { %v801_v48 = vunpack.i.h.bf16 %v799_v47  ;;  %v800_v49 = vunpack.i.l.bf16 %v799_v47 }
 0x70a   :  { %v591_v50 = vsel %vm138_vm2, %v1084_v61, %v801_v48  ;;  %v590_v0 = vsel %vm138_vm2, %v1082_v57, %v800_v49 }
 0x70b   :  { %v592_v51 = vpack.c.bf16 %v591_v50, %v590_v0 }
 0x70d   :  { %779 = vmatmul.mubr.msk.bf16.vlgmr.msra.gmra.mrb[16].mxu1 %vm83_vm1, %v592_v51 }
 0x7e0   :  { %v653_v53 = vpop.f32.mrb[16].mxu1 }
 0x7e1   :  { %v654_v54 = vadd.f32 %v692_v52, %v653_v53  ;;  %v780_v55 = vpop.f32.mrb[17].mxu1 }
 0x7e2   :  { %v656_v56 = vpop.f32.mrb[18].mxu1 }
 0x7e3   :  { %660 = vst.msk [vmem:[#allocation8] sm:$0xff] %vm83_vm1, %v654_v54  ;;  %v657_v58 = vadd.f32 %v692_v52, %v656_v56  ;;  %v781_v59 = vpop.f32.mrb[19].mxu1 }
 0x7e5   :  { %661 = vst.msk [vmem:[#allocation8 + $0x8] sm:$0xff] %vm83_vm1, %v657_v58 }
 0x7e6   :  { %900 = shalt.err (!%p897_p0)
}
 0x7e7   :  { %s901_s9 = scalar_lea.hbm %s1132_s4, 256 }
 0x7e8   :  { %p902_p1 = scmp.ne.s32.totalorder %s1132_s4, %s901_s9  ;;  %p905_p2 = scmp.lt.u32.totalorder %s901_s9, %s1132_s4 }
 0x7ea   :  { %p907_p3 = pnand %p905_p2, %p902_p1 }
 0x7ec   :  { %910 = shalt.err (!%p907_p3)
}
 0x7ed   :  { %s930_s13 = smov 128   ;;  %s931_s14 = smov 8  }
 0x7ee   :  { %673 = dma.vmem_to_hbm [thread:$0]  %s668_s6, 256, %s1132_s4, [#allocation4], %s930_s13, %s930_s13, %s931_s14  }
 0x7ef   :  { %915 = dma.done.wait [#allocation4], 256  }
 0x7f0   :  { %916 = vsyncadd [#allocation4], 4294967040 }
 0x7f1   :  { %677 = vsyncpa [#allocation3], 1 }
 0x7f2   :  { %678 = vsyncpa [#allocation6], 1 }
 0x7f3   :  { %679 = vsyncpa [#allocation4], 1 }

</bundles_post_ra>
